<compile_context>
chip_gen: v7x
topology: tpu7x:2x2x1
jax: 0.10.0
libtpu: 0.0.40
codegen_flags: <defaults>
</compile_context>

<pallas_src>
import jax
import jax.numpy as jnp
from jax.experimental import pallas as pl
from jax.experimental.pallas import tpu as pltpu


def _make_agg_kernel(n_other):
    """kernel(sort_idx_smem, fuse_w_smem, x_vmem, w_vmem, o_vmem)

    Grid = (nviews,), axis 0 ("parallel"): which output view is produced.
      sort_idx_smem: (nviews*n_other,) int32  — for target i, the other views
      fuse_w_smem:   (nviews,) float32        — fuse weights [w0, w1, ...]
      x_vmem:        (nviews, M, K) float32   — all view slabs, VMEM-resident
      w_vmem:        (n_other*K, K) bfloat16  — stacked FC weights of target i
      o_vmem:        (M, K) float32           — fused output slab of target i
    """

    def agg_kernel(sort_idx_ref, fuse_w_ref, x_ref, w_ref, o_ref):
        i = pl.program_id(0)

        # Target-view term (pure VPU scale, stays f32).
        acc = fuse_w_ref[0] * x_ref[i]

        # Fused LHS: the (nviews-1) other views, each pre-scaled by its fuse
        # weight (cheap VPU mul on the small operand), concatenated along the
        # contraction dim -> (M, n_other*K), then cast once to bf16.
        chunks = []
        for j in range(n_other):
            v = sort_idx_ref[i * n_other + j]
            chunks.append(fuse_w_ref[j + 1] * x_ref[v])
        lhs = jnp.concatenate(chunks, axis=-1).astype(jnp.bfloat16)

        # Single MXU pass: (M, 3K) @ (3K, K), f32 accumulation.
        acc = acc + jnp.dot(lhs, w_ref[...], preferred_element_type=jnp.float32)

        o_ref[...] = acc.astype(o_ref.dtype)

    return agg_kernel


def aggregation_forward(inputs, fc_weights, fuse_weights):
    """Pallas implementation of Aggregation.forward.

    inputs:       list of nviews arrays, each (N, C, H, W) float32
    fc_weights:   (nviews*(nviews-1), H*W, H*W) float32  (the 12 ChannelWiseFC
                  weight matrices, in PyTorch indexing order)
    fuse_weights: list/tuple of nviews floats (default [0.4, 0.2, 0.2, 0.2])
    returns:      list of nviews arrays, each (N, C, H, W) float32
    """
    nviews = len(inputs)
    N, C, H, W = inputs[0].shape
    M, K = N * C, H * W
    n_other = nviews - 1

    # Flatten each view to the 2-D slab used by ChannelWiseFC.
    x = jnp.stack([v.reshape(M, K) for v in inputs]).astype(jnp.float32)  # (nviews, M, K)

    # sort_views(): for target i, the other views in original order.
    order = []
    for i in range(nviews):
        order.extend([k for k in range(nviews) if k != i])
    sort_idx = jnp.asarray(order, dtype=jnp.int32)          # (nviews*n_other,)
    fuse_w = jnp.asarray(fuse_weights, dtype=jnp.float32)   # (nviews,)

    # For each target i, stack its (nviews-1) FC matrices vertically along the
    # contraction dim -> (nviews, (nviews-1)*K, K); ship as bf16 (f32 accumulate
    # in-kernel).  Pure reshape + cast of the parameters, done once.
    w_stacked = (
        jnp.asarray(fc_weights, dtype=jnp.float32)
        .reshape(nviews, n_other * K, K)
        .astype(jnp.bfloat16)
    )

    kernel = _make_agg_kernel(n_other)

    grid_spec = pltpu.PrefetchScalarGridSpec(
        num_scalar_prefetch=0,
        grid=(nviews,),
        in_specs=[
            # sort indices + fuse weights: small scalar tables in SMEM
            pl.BlockSpec(memory_space=pltpu.MemorySpace.SMEM),
            pl.BlockSpec(memory_space=pltpu.MemorySpace.SMEM),
            # all view slabs, whole array resident in VMEM (constant block idx)
            pl.BlockSpec((nviews, M, K), lambda i: (0, 0, 0)),
            # stacked ChannelWiseFC weights for target i
            pl.BlockSpec((pl.Squeezed(), n_other * K, K), lambda i: (i, 0, 0)),
        ],
        out_specs=pl.BlockSpec((pl.Squeezed(), M, K), lambda i: (i, 0, 0)),
    )

    cost = pl.CostEstimate(
        flops=2 * nviews * n_other * M * K * K,
        transcendentals=0,
        bytes_accessed=(nviews * n_other * K * K * 2    # bf16 weights
                        + nviews * M * K * 4            # activations in
                        + nviews * M * K * 4),          # fused outputs
    )

    out = pl.pallas_call(
        kernel,
        out_shape=jax.ShapeDtypeStruct((nviews, M, K), jnp.float32),
        grid_spec=grid_spec,
        compiler_params=pltpu.CompilerParams(
            dimension_semantics=("parallel",),
        ),
        cost_estimate=cost,
    )(sort_idx, fuse_w, x, w_stacked)

    return [out[i].reshape(N, C, H, W) for i in range(nviews)]


def aggregation_reference(inputs, fc_weights, fuse_weights):
    """Pure-JAX (f32) re-implementation of the PyTorch forward, for verification."""
    nviews = len(inputs)
    N, C, H, W = inputs[0].shape
    outputs = []
    index = 0
    for i in range(nviews):
        sorted_inputs = [inputs[i]] + [inputs[k] for k in range(nviews) if k != i]
        warped = [sorted_inputs[0]]
        for j in range(1, nviews):
            flat = sorted_inputs[j].reshape(N * C, H * W)
            fc_out = (flat @ fc_weights[index]).reshape(N, C, H, W)
            warped.append(fc_out)
            index += 1
        acc = jnp.zeros_like(warped[0])
        for v, w in zip(warped, fuse_weights):
            acc = acc + v * w
        outputs.append(acc)
    return outputs


if __name__ == "__main__":
    # Small shapes consistent with the module: nviews=4 camera views,
    # N=2 batch, C=4 joints/channels, heatmap H=W=16 (so ChannelWiseFC is 256x256).
    NVIEWS = 4
    N, C, H, W = 2, 4, 16, 16
    NUM_NETS = NVIEWS * (NVIEWS - 1)          # 12
    FUSE_WEIGHTS = [0.4, 0.2, 0.2, 0.2]

    key = jax.random.PRNGKey(0)
    keys = jax.random.split(key, NVIEWS + 1)
    inputs = [
        jax.random.normal(keys[i], (N, C, H, W), dtype=jnp.float32)
        for i in range(NVIEWS)
    ]
    # ChannelWiseFC weights: uniform(0, 0.1), deterministic.
    fc_weights = jax.random.uniform(
        keys[NVIEWS], (NUM_NETS, H * W, H * W),
        dtype=jnp.float32, minval=0.0, maxval=0.1,
    )

    outs = aggregation_forward(inputs, fc_weights, FUSE_WEIGHTS)
    outs = [jax.block_until_ready(o) for o in outs]

    refs = aggregation_reference(inputs, fc_weights, FUSE_WEIGHTS)
    # Tolerance accounts for bf16 quantization of the FC weights / scaled LHS
    # inside the kernel (accumulation stays f32); observed error is ~1e-3.
    for o, r in zip(outs, refs):
        assert o.shape == (N, C, H, W)
        assert jnp.allclose(o, r, rtol=1e-2, atol=1e-2), "mismatch vs reference"

    print("KERNEL_OK")
</pallas_src>

<mosaic_0001>
module attributes {stable_mosaic.version = 11 : i64} {
  func.func @agg_kernel(%arg0: i32, %arg1: memref<12xi32, #tpu.memory_space<smem>>, %arg2: memref<4xf32, #tpu.memory_space<smem>>, %arg3: memref<4x8x256xf32, #tpu.memory_space<vmem>>, %arg4: memref<1x768x256xbf16, #tpu.memory_space<vmem>>, %arg5: memref<1x8x256xf32, #tpu.memory_space<vmem>>) attributes {dimension_semantics = [#tpu.dimension_semantics<parallel>], iteration_bounds = array<i64: 4>, scalar_prefetch = 0 : i64, scratch_operands = 0 : i64, tpu.core_type = #tpu.core_type<tc>, window_params = [{transform_indices = @transform_0, window_bounds = array<i64: 12>}, {transform_indices = @transform_1, window_bounds = array<i64: 4>}, {pipeline_mode = #tpu.pipeline_mode<synchronous>, transform_indices = @transform_2, window_bounds = array<i64: 4, 8, 256>}, {transform_indices = @transform_3, window_bounds = array<i64: 1, 768, 256>}, {transform_indices = @transform_4, window_bounds = array<i64: 1, 8, 256>}]} {
    %c0 = arith.constant 0 : index
    %0 = memref.load %arg2[%c0] : memref<4xf32, #tpu.memory_space<smem>>
    %1 = arith.index_cast %arg0 : i32 to index
    %c0_0 = arith.constant 0 : index
    %c0_1 = arith.constant 0 : index
    %2 = vector.load %arg3[%1, %c0_0, %c0_1] : memref<4x8x256xf32, #tpu.memory_space<vmem>>, vector<1x8x256xf32>
    %3 = vector.shape_cast %2 : vector<1x8x256xf32> to vector<8x256xf32>
    %4 = vector.broadcast %0 : f32 to vector<8x256xf32>
    %5 = arith.mulf %4, %3 : vector<8x256xf32>
    %c3_i32 = arith.constant 3 : i32
    %6 = arith.muli %arg0, %c3_i32 : i32
    %c0_i32 = arith.constant 0 : i32
    %7 = arith.addi %6, %c0_i32 : i32
    %8 = arith.index_cast %7 : i32 to index
    %9 = memref.load %arg1[%8] : memref<12xi32, #tpu.memory_space<smem>>
    %c1 = arith.constant 1 : index
    %10 = memref.load %arg2[%c1] : memref<4xf32, #tpu.memory_space<smem>>
    %11 = arith.index_cast %9 : i32 to index
    %c0_2 = arith.constant 0 : index
    %c0_3 = arith.constant 0 : index
    %12 = vector.load %arg3[%11, %c0_2, %c0_3] : memref<4x8x256xf32, #tpu.memory_space<vmem>>, vector<1x8x256xf32>
    %13 = vector.shape_cast %12 : vector<1x8x256xf32> to vector<8x256xf32>
    %14 = vector.broadcast %10 : f32 to vector<8x256xf32>
    %15 = arith.mulf %14, %13 : vector<8x256xf32>
    %c3_i32_4 = arith.constant 3 : i32
    %16 = arith.muli %arg0, %c3_i32_4 : i32
    %c1_i32 = arith.constant 1 : i32
    %17 = arith.addi %16, %c1_i32 : i32
    %18 = arith.index_cast %17 : i32 to index
    %19 = memref.load %arg1[%18] : memref<12xi32, #tpu.memory_space<smem>>
    %c2 = arith.constant 2 : index
    %20 = memref.load %arg2[%c2] : memref<4xf32, #tpu.memory_space<smem>>
    %21 = arith.index_cast %19 : i32 to index
    %c0_5 = arith.constant 0 : index
    %c0_6 = arith.constant 0 : index
    %22 = vector.load %arg3[%21, %c0_5, %c0_6] : memref<4x8x256xf32, #tpu.memory_space<vmem>>, vector<1x8x256xf32>
    %23 = vector.shape_cast %22 : vector<1x8x256xf32> to vector<8x256xf32>
    %24 = vector.broadcast %20 : f32 to vector<8x256xf32>
    %25 = arith.mulf %24, %23 : vector<8x256xf32>
    %c3_i32_7 = arith.constant 3 : i32
    %26 = arith.muli %arg0, %c3_i32_7 : i32
    %c2_i32 = arith.constant 2 : i32
    %27 = arith.addi %26, %c2_i32 : i32
    %28 = arith.index_cast %27 : i32 to index
    %29 = memref.load %arg1[%28] : memref<12xi32, #tpu.memory_space<smem>>
    %c3 = arith.constant 3 : index
    %30 = memref.load %arg2[%c3] : memref<4xf32, #tpu.memory_space<smem>>
    %31 = arith.index_cast %29 : i32 to index
    %c0_8 = arith.constant 0 : index
    %c0_9 = arith.constant 0 : index
    %32 = vector.load %arg3[%31, %c0_8, %c0_9] : memref<4x8x256xf32, #tpu.memory_space<vmem>>, vector<1x8x256xf32>
    %33 = vector.shape_cast %32 : vector<1x8x256xf32> to vector<8x256xf32>
    %34 = vector.broadcast %30 : f32 to vector<8x256xf32>
    %35 = arith.mulf %34, %33 : vector<8x256xf32>
    %36 = tpu.concatenate %15, %25, %35 in 1 : vector<8x256xf32>, vector<8x256xf32>, vector<8x256xf32> -> vector<8x768xf32>
    %37 = arith.truncf %36 : vector<8x768xf32> to vector<8x768xbf16>
    %c0_10 = arith.constant 0 : index
    %c0_11 = arith.constant 0 : index
    %c0_12 = arith.constant 0 : index
    %38 = vector.load %arg4[%c0_10, %c0_11, %c0_12] : memref<1x768x256xbf16, #tpu.memory_space<vmem>>, vector<1x768x256xbf16>
    %39 = vector.shape_cast %38 : vector<1x768x256xbf16> to vector<768x256xbf16>
    %cst = arith.constant dense<0.000000e+00> : vector<8x256xf32>
    %40 = tpu.matmul %37, %39, %cst {dimension_numbers = #tpu.dot_dimension_numbers<[1], [0], [0], [1], [0, 0, 1, 1], [], []>} : vector<8x768xbf16>, vector<768x256xbf16>, vector<8x256xf32> -> vector<8x256xf32>
    %41 = arith.addf %5, %40 : vector<8x256xf32>
    %c0_13 = arith.constant 0 : index
    %c0_14 = arith.constant 0 : index
    %c0_15 = arith.constant 0 : index
    %42 = vector.load %arg5[%c0_13, %c0_14, %c0_15] : memref<1x8x256xf32, #tpu.memory_space<vmem>>, vector<1x8x256xf32>
    %43 = vector.shape_cast %42 : vector<1x8x256xf32> to vector<8x256xf32>
    %44 = vector.shape_cast %41 : vector<8x256xf32> to vector<1x8x256xf32>
    tpu.vector_store %arg5[%c0_13, %c0_14, %c0_15], %44 {strides = array<i32>} : memref<1x8x256xf32, #tpu.memory_space<vmem>>, vector<1x8x256xf32>,
    return
  }
  func.func @transform_0(%arg0: i32) -> i32 {
    %c0_i32 = arith.constant 0 : i32
    %c0_i32_0 = arith.constant 0 : i32
    return %c0_i32 : i32
  }
  func.func @transform_1(%arg0: i32) -> i32 {
    %c0_i32 = arith.constant 0 : i32
    %c0_i32_0 = arith.constant 0 : i32
    return %c0_i32 : i32
  }
  func.func @transform_2(%arg0: i32) -> (i32, i32, i32) {
    %c0_i32 = arith.constant 0 : i32
    %c0_i32_0 = arith.constant 0 : i32
    %c0_i32_1 = arith.constant 0 : i32
    %c0_i32_2 = arith.constant 0 : i32
    return %c0_i32, %c0_i32_0, %c0_i32_1 : i32, i32, i32
  }
  func.func @transform_3(%arg0: i32) -> (i32, i32, i32) {
    %c0_i32 = arith.constant 0 : i32
    %c0_i32_0 = arith.constant 0 : i32
    %c0_i32_1 = arith.constant 0 : i32
    return %arg0, %c0_i32, %c0_i32_0 : i32, i32, i32
  }
  func.func @transform_4(%arg0: i32) -> (i32, i32, i32) {
    %c0_i32 = arith.constant 0 : i32
    %c0_i32_0 = arith.constant 0 : i32
    %c0_i32_1 = arith.constant 0 : i32
    return %arg0, %c0_i32, %c0_i32_0 : i32, i32, i32
  }
}

</mosaic_0001>

<bundles_post_ra>
// kernel: tpu_custom_call.1
= control target key start
LH: loop header
LB: loop body
LE: loop exit
PB: predicated region body
PF: predicated region fallthrough
CT: control target
= control target key end

     0   :  { %9 = vsyncpa [#allocation5], 0  ;;  %s2072_s0 = inlined_call_operand.hbm [shape: s32[12], index: 0, kind: input, shape index: {}]   ;;  %s2073_s1 = inlined_call_operand.hbm [shape: f32[4], index: 1, kind: input, shape index: {}]   ;;  %s2074_s2 = inlined_call_operand.hbm [shape: f32[4,8,256], index: 2, kind: input, shape index: {}]   ;;  %s2075_s3 = inlined_call_operand.hbm [shape: bf16[4,768,256], index: 3, kind: input, shape index: {}]   ;;  %s2076_s4 = inlined_call_operand.hbm [shape: f32[4,8,256], index: 4, kind: output, shape index: {}]  }
   0x1   :  { %10 = vsyncpa [#allocation7], 0 }
   0x2   :  { %11 = vsyncpa [#allocation3], 0 }
   0x3   :  { %12 = vsyncpa [#allocation10], 0 }
   0x4   :  { %14 = vsyncpa [#allocation10 + $0x1], 0 }
   0x5   :  { %15 = vsyncpa [#allocation4], 0 }
   0x6   :  { %17 = vsyncpa [#allocation4 + $0x1], 0  ;;  %s1687_s15 = smov 0   ;;  %s1689_s16 = smov 0  }
   0x7   :  { %s1691_s17 = smov 0   ;;  %s1693_s18 = smov 0  }
   0x8 LB: > { %s1708_s19 = sadd.s32 4294967295, %s1651_s18   ;;  %s1132_s20 = sadd.s32 4294967294, %s1651_s18   ;;  %s1651_s18 = sphi %s1693_s18, %s2099_s18   ;;  %s1647_s17 = sphi %s1691_s17, %s2098_s17   ;;  %s1643_s16 = sphi %s1689_s16, %s2097_s16   ;;  %s1639_s15 = sphi %s1687_s15, %s2096_s15  }
   0x9   : > { %p106_p0 = scmp.ne.s32.totalorder %s1643_s16, %s1639_s15  ;;  %p2077_p1 = scmp.eq.s32.totalorder %s1708_s19, 0 }
   0xa   : > { %p136_p3 = scmp.eq.s32.totalorder %s1132_s20, 3  ;;  %p1133_p5 = scmp.ge.s32.totalorder %s1651_s18, 1 }
   0xb   : > { %p1717_p4 = por %p2077_p1, %p106_p0  ;;  %p143_p7 = scmp.lt.s32.totalorder %s1651_s18, 5 }
   0xc   : > { %p1722_p6 = por %p136_p3, %p106_p0  ;;  %s1653_s24 = smov [#allocation8]  }
   0xd   : > { %s2080_s21 = scalar_select %p1717_p4, 1, 0 }
   0xe   : > { %s2081_s22 = scalar_select %p1722_p6, 1, 0 }
   0xf   : > { %p1727_p8 = pnand %p1133_p5, %p143_p7  ;;  %s173_s25 = sshll.u32 %s1653_s24, 4  ;;  %s1733_s25 = int_to_ptr.vmem [resolvable:$true] %s173_s25 }
  0x10   : > { %s1742_s27 = sadd.s32 1, %s1651_s18   ;;  %s1489_s30 = scalar_lea.hbm %s2072_s0, 16 }
  0x11   : > { %p1280_p9 = pneg %p1727_p8  ;;  %p1490_p11 = scmp.ne.s32.totalorder %s2072_s0, %s1489_s30 }
  0x12   : > { %p1496_p3 = scmp.lt.u32.totalorder %s1489_s30, %s2072_s0 }
  0x13   : > { %p1737_p10 = pnand %p1280_p9, %p2077_p1 }
  0x15   : > { %p1491_p12 = pneg %p1737_p10 }
  0x17   : > { %p1492_p13 = pnand %p1491_p12, %p1490_p11 }
  0x19   : > { %p1493_p0 = pneg %p1492_p13 }
  0x1b   : > { %p1498_p5 = pnand %p1496_p3, %p1493_p0 }
  0x1d   : > { %1501 = shalt.err (!%p1498_p5)
}
  0x1e   : > { %s1654_s9 = smov [#allocation2]   ;;  %s1502_s14 = scalar_lea.hbm %s2073_s1, 16 }
  0x1f   : > { %1283 = dma.hbm_to_smem (!%p1737_p10), %s2072_s0, 16, %s1654_s9, [#allocation5]  }
  0x20   : > { %p1503_p7 = scmp.ne.s32.totalorder %s2073_s1, %s1502_s14  ;;  %p1509_p13 = scmp.lt.u32.totalorder %s1502_s14, %s2073_s1 }
  0x22   : > { %p1505_p9 = pnand %p1503_p7, %p1491_p12 }
  0x24   : > { %p1506_p11 = pneg %p1505_p9 }
  0x26   : > { %p1511_p0 = pnand %p1509_p13, %p1506_p11 }
  0x28   : > { %1514 = shalt.err (!%p1511_p0)
}
  0x29   : > { %s1655_s30 = smov [#allocation6]   ;;  %s1515_s9 = scalar_lea.hbm %s2074_s2, 1024 }
  0x2a   : > { %1286 = dma.hbm_to_smem (!%p1737_p10), %s2073_s1, 16, %s1655_s30, [#allocation7]  }
  0x2b   : > { %p1516_p3 = scmp.ne.s32.totalorder %s2074_s2, %s1515_s9  ;;  %p1522_p9 = scmp.lt.u32.totalorder %s1515_s9, %s2074_s2 }
  0x2d   : > { %p1518_p5 = pnand %p1516_p3, %p1491_p12 }
  0x2f   : > { %p1519_p7 = pneg %p1518_p5 }
  0x31   : > { %p1524_p11 = pnand %p1522_p9, %p1519_p7 }
  0x33   : > { %1527 = shalt.err (!%p1524_p11)
}
  0x34   : > { %s1528_s14 = scalar_lea.vmem %s1733_s25, 1024  ;;  %p1536_p2 = scmp.lt.s32.totalorder %s1733_s25, %s1733_s25 }
  0x35   : > { %p1529_p13 = scmp.ne.s32.totalorder %s1733_s25, %s1528_s14  ;;  %p1537_p3 = scmp.lt.s32.totalorder %s1528_s14, %s1528_s14 }
  0x37   : > { %p1531_p0 = pnand %p1529_p13, %p1491_p12  ;;  %p1538_p5 = por %p1537_p3, %p1536_p2 }
  0x39   : > { %p1532_p1 = pneg %p1531_p0 }
  0x3b   : > { %p1539_p6 = pnand %p1538_p5, %p1532_p1 }
  0x3d   : > { %1542 = shalt.err (!%p1539_p6)
}
  0x3e   : > { %s1656_s20 = smov 256   ;;  %s1657_s24 = smov 16  }
  0x3f   : > { %1289 = dma.hbm_to_vmem [thread:$0]  (!%p1737_p10), %s2074_s2, 1024, %s1733_s25, [#allocation3], %s1656_s20, %s1656_s20, %s1657_s24  }
  0x40   : > { %s90_s30 = ssub.s32 %s1651_s18, %s1742_s27  ;;  %s93_s5 = sadd.s32 1, %s1647_s17 }
  0x41   : > { %p91_p1 = scmp.eq.s32.totalorder %s90_s30, 0  ;;  %p100_p2 = scmp.ne.s32.totalorder %s1647_s17, %s1643_s16 }
  0x42   : > { %p101_p6 = scmp.eq.s32.totalorder %s1651_s18, 0  ;;  %p1301_p12 = scmp.lt.s32.totalorder %s1651_s18, 4 }
  0x43   : > { %s1813_s6 = scalar_select %p91_p1, %s1647_s17, %s93_s5  }
  0x44   : > { %p102_p7 = por %p101_p6, %p100_p2  ;;  %p2084_p9 = scmp.eq.s32.totalorder %s1708_s19, 3 }
  0x45   : > { %s187_s8 = sand.u32 1, %s1647_s17   ;;  %s1262_s26 = smul.u32 12288, %s1651_s18 }
  0x46   : > { %p1817_p11 = por %p2084_p9, %p100_p2  ;;  %s1261_s9 = smul.u32 768, %s187_s8 }
  0x47   : > { %s1826_s25 = scalar_lea.hbm %s2075_s3, %s1262_s26  ;;  %p1828_p10 = pnand %p1301_p12, %p102_p7 }
  0x48   : > { %s2085_s7 = scalar_select %p1817_p11, 1, 0 }
  0x49   : > { %s191_s13 = scalar_lea.vmem [#allocation9], %s1261_s9  ;;  %s1834_s20 = scalar_lea.sflag [#allocation10], %s187_s8 }
  0x4a   : > { %s198_s14 = sshll.u32 %s191_s13, 4  ;;  %s1543_s24 = scalar_lea.hbm %s1826_s25, 12288  ;;  %s1832_s14 = int_to_ptr.vmem [resolvable:$true] %s198_s14 }
  0x4b   : > { %p1544_p13 = scmp.ne.s32.totalorder %s1826_s25, %s1543_s24  ;;  %p1545_p0 = pneg %p1828_p10 }
  0x4c   : > { %s1548_s30 = scalar_lea.hbm %s2075_s3, 49152  ;;  %p1549_p1 = scmp.lt.u32.totalorder %s1826_s25, %s2075_s3 }
  0x4d   : > { %p1546_p3 = pnand %p1545_p0, %p1544_p13  ;;  %p1550_p2 = scmp.lt.u32.totalorder %s1548_s30, %s1543_s24 }
  0x4e   : > { %p1552_p12 = scmp.lt.u32.totalorder %s1543_s24, %s1826_s25 }
  0x4f   : > { %p1547_p5 = pneg %p1546_p3  ;;  %p1551_p6 = por %p1550_p2, %p1549_p1 }
  0x51   : > { %p1553_p7 = por %p1552_p12, %p1551_p6 }
  0x53   : > { %p1554_p9 = pnand %p1553_p7, %p1547_p5 }
  0x55   : > { %1557 = shalt.err (!%p1554_p9)
}
  0x56   : > { %s1558_s8 = scalar_lea.vmem %s1832_s14, 12288  ;;  %s1658_s9 = smov [#allocation9]  }
  0x57   : > { %p1559_p13 = scmp.ne.s32.totalorder %s1832_s14, %s1558_s8  ;;  %s1563_s10 = sshll.u32 %s1658_s9, 4  ;;  %s1564_s10 = int_to_ptr.vmem [resolvable:$false] %s1563_s10 }
  0x58   : > { %s1565_s11 = scalar_lea.vmem %s1564_s10, 24576  ;;  %p1566_p4 = scmp.lt.s32.totalorder %s1832_s14, %s1564_s10 }
  0x59   : > { %p1561_p3 = pnand %p1559_p13, %p1545_p0  ;;  %p1567_p1 = scmp.lt.s32.totalorder %s1565_s11, %s1558_s8 }
  0x5b   : > { %p1562_p11 = pneg %p1561_p3  ;;  %p1568_p2 = por %p1567_p1, %p1566_p4 }
  0x5d   : > { %p1569_p6 = pnand %p1568_p2, %p1562_p11 }
  0x5f   : > { %1572 = shalt.err (!%p1569_p6)
}
  0x60   : > { %s1659_s13 = smov 128   ;;  %s1660_s24 = smov 8  }
  0x61   : > { %1293 = dma.hbm_to_vmem [thread:$0]  (!%p1828_p10), %s1826_s25, 12288, %s1832_s14, %s1834_s20, %s1659_s13, %s1659_s13, %s1660_s24  }
  0x62   : > { %210 = sbr.rel (%p1727_p8) target bundleno = 479 (0x1df), region = 36  ;;  %p2087_p0 = scmp.eq.s32.totalorder (!%p1727_p8), %s1708_s19, 0 }
  0x69   : > { %1618 = dma.done.wait (%p2087_p0), [#allocation5], 16   ;;  %p2088_p5 = pmov %p2087_p0 }
  0x6a   : > { %p2089_p4 = pmov %p2087_p0 }
  0x6b   : > { %1620 = vsyncadd (%p2088_p5), [#allocation5], 4294967280 }
  0x6c   : > { %1622 = dma.done.wait (%p2089_p4), [#allocation7], 16   ;;  %p2090_p11 = pmov %p2087_p0 }
  0x6d   : > { %p2091_p12 = pmov %p2087_p0 }
  0x6e   : > { %1624 = vsyncadd (%p2090_p11), [#allocation7], 4294967280 }
  0x6f   : > { %1626 = dma.done.wait (%p2091_p12), [#allocation3], 1024   ;;  %p2092_p10 = pmov %p2087_p0 }
  0x70   : > { %s1877_s23 = sand.u32 1, %s1643_s16   ;;  %p2093_p8 = scmp.ne.s32.totalorder %s2080_s21, 0 }
  0x71   : > { %1628 = vsyncadd (%p2092_p10), [#allocation3], 4294966272  ;;  %s1263_s25 = smul.u32 768, %s1877_s23  ;;  %s225_s12 = scalar_lea.sflag [#allocation10], %s1877_s23 }
  0x73   : > { %s1881_s14 = scalar_lea.vmem [#allocation9], %s1263_s25 }
  0x74   : > { %1630 = dma.done.wait (%p2093_p8), %s225_s12, 12288  }
  0x75   : > { %1632 = vsyncadd (%p2093_p8), %s225_s12, 4294955008 }
  0x76   : > { %233 = sfence }
  0x77   : > { %v1345_v0 = vld [vmem:[%s1881_s14 + $0x4] ss:$8 sps:$4 sm:$0xff]   ;;  %v1349_v2 = vld [vmem:[%s1881_s14] ss:$8 sps:$4 sm:$0xff]   ;;  %v1351_v4 = vld [vmem:[%s1881_s14 + $0x14] ss:$8 sps:$4 sm:$0xff]  }
  0x78   : > { %v1347_v1 = vld [vmem:[%s1881_s14 + $0x104] ss:$8 sps:$4 sm:$0xff]   ;;  %878 = vmatprep.subr.bf16.mxu0 %v1345_v0  ;;  %v1350_v3 = vld [vmem:[%s1881_s14 + $0x100] ss:$8 sps:$4 sm:$0xff]   ;;  %v1353_v5 = vld [vmem:[%s1881_s14 + $0x114] ss:$8 sps:$4 sm:$0xff]  }
  0x79   : > { %919 = vmatprep.subr.bf16.mxu1 %v1347_v1  ;;  %879 = vmatpush1.bf16.msra.mxu0 %v1349_v2  ;;  %v1355_v6 = vld [vmem:[%s1881_s14 + $0x10] ss:$8 sps:$4 sm:$0xff]   ;;  %v1357_v8 = vld [vmem:[%s1881_s14 + $0x24] ss:$8 sps:$4 sm:$0xff]   ;;  %v1361_v10 = vld [vmem:[%s1881_s14 + $0x20] ss:$8 sps:$4 sm:$0xff]  }
  0x7a   : > { %920 = vmatpush1.bf16.msra.mxu1 %v1350_v3  ;;  %880 = vmatprep.subr.bf16.mxu0 %v1351_v4  ;;  %v1356_v7 = vld [vmem:[%s1881_s14 + $0x110] ss:$8 sps:$4 sm:$0xff]   ;;  %v1359_v9 = vld [vmem:[%s1881_s14 + $0x124] ss:$8 sps:$4 sm:$0xff]   ;;  %v1362_v11 = vld [vmem:[%s1881_s14 + $0x120] ss:$8 sps:$4 sm:$0xff]  }
  0x7b   : > { %921 = vmatprep.subr.bf16.mxu1 %v1353_v5  ;;  %v1363_v12 = vld [vmem:[%s1881_s14 + $0x34] ss:$8 sps:$4 sm:$0xff]   ;;  %v1367_v14 = vld [vmem:[%s1881_s14 + $0x30] ss:$8 sps:$4 sm:$0xff]   ;;  %v1369_v16 = vld [vmem:[%s1881_s14 + $0x44] ss:$8 sps:$4 sm:$0xff]  }
  0x7c   : > { %v1365_v13 = vld [vmem:[%s1881_s14 + $0x134] ss:$8 sps:$4 sm:$0xff]   ;;  %v1368_v15 = vld [vmem:[%s1881_s14 + $0x130] ss:$8 sps:$4 sm:$0xff]   ;;  %v1371_v17 = vld [vmem:[%s1881_s14 + $0x144] ss:$8 sps:$4 sm:$0xff]  }
  0x7d   : > { %881 = vmatpush1.bf16.msra.mxu0 %v1355_v6  ;;  %v1373_v18 = vld [vmem:[%s1881_s14 + $0x40] ss:$8 sps:$4 sm:$0xff]   ;;  %v1375_v20 = vld [vmem:[%s1881_s14 + $0x54] ss:$8 sps:$4 sm:$0xff]   ;;  %v1379_v22 = vld [vmem:[%s1881_s14 + $0x50] ss:$8 sps:$4 sm:$0xff]  }
  0x7e   : > { %922 = vmatpush1.bf16.msra.mxu1 %v1356_v7  ;;  %882 = vmatprep.subr.bf16.mxu0 %v1357_v8  ;;  %v1374_v19 = vld [vmem:[%s1881_s14 + $0x140] ss:$8 sps:$4 sm:$0xff]   ;;  %v1377_v21 = vld [vmem:[%s1881_s14 + $0x154] ss:$8 sps:$4 sm:$0xff]   ;;  %v1380_v23 = vld [vmem:[%s1881_s14 + $0x150] ss:$8 sps:$4 sm:$0xff]  }
  0x7f   : > { %923 = vmatprep.subr.bf16.mxu1 %v1359_v9  ;;  %v1381_v24 = vld [vmem:[%s1881_s14 + $0x64] ss:$8 sps:$4 sm:$0xff]   ;;  %s1914_s21 = smul.u32 3, %s1708_s19  ;;  %v1385_v26 = vld [vmem:[%s1881_s14 + $0x60] ss:$8 sps:$4 sm:$0xff]   ;;  %s1933_s30 = sld [smem:[#allocation6 + $0x1]] }
  0x80   : > { %v1383_v25 = vld [vmem:[%s1881_s14 + $0x164] ss:$8 sps:$4 sm:$0xff]   ;;  %v1386_v27 = vld [vmem:[%s1881_s14 + $0x160] ss:$8 sps:$4 sm:$0xff]   ;;  %v1387_v28 = vld [vmem:[%s1881_s14 + $0x74] ss:$8 sps:$4 sm:$0xff]  }
  0x81   : > { %883 = vmatpush1.bf16.msra.mxu0 %v1361_v10  ;;  %v1389_v29 = vld [vmem:[%s1881_s14 + $0x174] ss:$8 sps:$4 sm:$0xff]   ;;  %s274_s20 = sadd.s32 1, %s1914_s21  ;;  %v1391_v30 = vld [vmem:[%s1881_s14 + $0x70] ss:$8 sps:$4 sm:$0xff]   ;;  %s1926_s28 = sld [smem:[#allocation2 + %s1914_s21]] }
  0x82   : > { %924 = vmatpush1.bf16.msra.mxu1 %v1362_v11  ;;  %884 = vmatprep.subr.bf16.mxu0 %v1363_v12  ;;  %v1392_v31 = vld [vmem:[%s1881_s14 + $0x170] ss:$8 sps:$4 sm:$0xff]   ;;  %v1393_v32 = vld [vmem:[%s1881_s14 + $0x84] ss:$8 sps:$4 sm:$0xff]   ;;  %s1928_s29 = sld [smem:[#allocation2 + %s274_s20]]  ;;  %s285_s11 = sadd.s32 2, %s1914_s21 }
  0x83   : > { %925 = vmatprep.subr.bf16.mxu1 %v1365_v13  ;;  %v1395_v33 = vld [vmem:[%s1881_s14 + $0x184] ss:$8 sps:$4 sm:$0xff]   ;;  %v1397_v34 = vld [vmem:[%s1881_s14 + $0x80] ss:$8 sps:$4 sm:$0xff]   ;;  %v1399_v36 = vld [vmem:[%s1881_s14 + $0x94] ss:$8 sps:$4 sm:$0xff]  }
  0x84   : > { %v1398_v35 = vld [vmem:[%s1881_s14 + $0x180] ss:$8 sps:$4 sm:$0xff]   ;;  %v1401_v37 = vld [vmem:[%s1881_s14 + $0x194] ss:$8 sps:$4 sm:$0xff]   ;;  %s1936_s5 = sld [smem:[#allocation6 + $0x2]]  ;;  %s1975_s24 = sld [smem:[#allocation6 + $0x3]] }
  0x85   : > { %885 = vmatpush1.bf16.msra.mxu0 %v1367_v14  ;;  %v1403_v38 = vld [vmem:[%s1881_s14 + $0x90] ss:$8 sps:$4 sm:$0xff]   ;;  %v1405_v40 = vld [vmem:[%s1881_s14 + $0xa4] ss:$8 sps:$4 sm:$0xff]   ;;  %v1409_v42 = vld [vmem:[%s1881_s14 + $0xa0] ss:$8 sps:$4 sm:$0xff]   ;;  %v271_v45 = vstv %s1933_s30 }
  0x86   : > { %926 = vmatpush1.bf16.msra.mxu1 %v1368_v15  ;;  %886 = vmatprep.subr.bf16.mxu0 %v1369_v16  ;;  %v1404_v39 = vld [vmem:[%s1881_s14 + $0x190] ss:$8 sps:$4 sm:$0xff]   ;;  %v1407_v41 = vld [vmem:[%s1881_s14 + $0x1a4] ss:$8 sps:$4 sm:$0xff]   ;;  %v1410_v43 = vld [vmem:[%s1881_s14 + $0x1a0] ss:$8 sps:$4 sm:$0xff]  }
  0x87   : > { %927 = vmatprep.subr.bf16.mxu1 %v1371_v17  ;;  %s1257_s26 = sshll.u32 %s1926_s28, 4  ;;  %v1411_v44 = vld [vmem:[%s1881_s14 + $0xb4] ss:$8 sps:$4 sm:$0xff]   ;;  %v1415_v48 = vld [vmem:[%s1881_s14 + $0xb0] ss:$8 sps:$4 sm:$0xff]   ;;  %s1967_s13 = sld [smem:[#allocation2 + %s285_s11]] }
  0x88   : > { %s1258_s8 = sshll.u32 %s1928_s29, 4  ;;  %v1413_v46 = vld [vmem:[%s1881_s14 + $0x1b4] ss:$8 sps:$4 sm:$0xff]   ;;  %v1416_v49 = vld [vmem:[%s1881_s14 + $0x1b0] ss:$8 sps:$4 sm:$0xff]   ;;  %s1952_s9 = scalar_lea.vmem [#allocation8], %s1257_s26 }
  0x89   : > { %887 = vmatpush1.bf16.msra.mxu0 %v1373_v18  ;;  %v270_v50 = vld [vmem:[%s1952_s9 + $0x8] sm:$0xff]  ;;  %s1955_s10 = scalar_lea.vmem [#allocation8], %s1258_s8  ;;  %v1423_v60 = vld [vmem:[%s1881_s14 + $0xd4] ss:$8 sps:$4 sm:$0xff]   ;;  %v1427_v62 = vld [vmem:[%s1881_s14 + $0xd0] ss:$8 sps:$4 sm:$0xff]  }
  0x8a   : > { %928 = vmatpush1.bf16.msra.mxu1 %v1374_v19  ;;  %888 = vmatprep.subr.bf16.mxu0 %v1375_v20  ;;  %v282_v47 = vstv %s1936_s5  ;;  %v281_v51 = vld [vmem:[%s1955_s10 + $0x8] sm:$0xff]  ;;  %v273_v53 = vmul.f32 %v271_v45, %v270_v50  ;;  %v1425_v61 = vld [vmem:[%s1881_s14 + $0x1d4] ss:$8 sps:$4 sm:$0xff]   ;;  %v1428_v63 = vld [vmem:[%s1881_s14 + $0x1d0] ss:$8 sps:$4 sm:$0xff]   ;;  %s254_s21 = sld [smem:[#allocation6]] }
  0x8b   : > { %929 = vmatprep.subr.bf16.mxu1 %v1377_v21  ;;  %v1417_v52 = vld [vmem:[%s1881_s14 + $0xc4] ss:$8 sps:$4 sm:$0xff]   ;;  %v284_v54 = vmul.f32 %v282_v47, %v281_v51  ;;  %v1421_v58 = vld [vmem:[%s1881_s14 + $0xc0] ss:$8 sps:$4 sm:$0xff]   ;;  %v1435_v4 = vld [vmem:[%s1881_s14 + $0xf4] ss:$8 sps:$4 sm:$0xff]   ;;  %v293_v15 = vstv %s1975_s24 }
  0x8c   : > { %v1419_v55 = vld [vmem:[%s1881_s14 + $0x1c4] ss:$8 sps:$4 sm:$0xff]   ;;  %v297_v56 = vpack.c.bf16 %v273_v53, %v273_v53  ;;  %v1422_v59 = vld [vmem:[%s1881_s14 + $0x1c0] ss:$8 sps:$4 sm:$0xff]   ;;  %v1437_v7 = vld [vmem:[%s1881_s14 + $0x1f4] ss:$8 sps:$4 sm:$0xff]  }
  0x8d   : > { %889 = vmatpush1.bf16.msra.mxu0 %v1379_v22  ;;  %v299_v57 = vpack.c.bf16 %v284_v54, %v284_v54  ;;  %v1429_v0 = vld [vmem:[%s1881_s14 + $0xe4] ss:$8 sps:$4 sm:$0xff]   ;;  %v1433_v2 = vld [vmem:[%s1881_s14 + $0xe0] ss:$8 sps:$4 sm:$0xff]   ;;  %v1439_v8 = vld [vmem:[%s1881_s14 + $0xf0] ss:$8 sps:$4 sm:$0xff]  }
  0x8e   : > { %930 = vmatpush1.bf16.msra.mxu1 %v1380_v23  ;;  %890 = vmatprep.subr.bf16.mxu0 %v1381_v24  ;;  %v1431_v1 = vld [vmem:[%s1881_s14 + $0x1e4] ss:$8 sps:$4 sm:$0xff]   ;;  %v1434_v3 = vld [vmem:[%s1881_s14 + $0x1e0] ss:$8 sps:$4 sm:$0xff]   ;;  %s1259_s25 = sshll.u32 %s1967_s13, 4  ;;  %s1256_s20 = sshll.u32 %s1708_s19, 4 }
  0x8f   : > { %931 = vmatprep.subr.bf16.mxu1 %v1383_v25  ;;  %910 = vmatprep.mubr.bf16.mxu0 %v297_v56  ;;  %v269_v5 = vld [vmem:[%s1952_s9] sm:$0xff]  ;;  %v1440_v11 = vld [vmem:[%s1881_s14 + $0x1f0] ss:$8 sps:$4 sm:$0xff]   ;;  %v1446_v17 = vld [vmem:[%s1881_s14 + $0x214] ss:$8 sps:$4 sm:$0xff]   ;;  %s1986_s12 = scalar_lea.vmem [#allocation8], %s1259_s25 }
  0x90   : > { %951 = vmatprep.mubr.bf16.mxu1 %v299_v57  ;;  %v280_v6 = vld [vmem:[%s1955_s10] sm:$0xff]  ;;  %v272_v9 = vmul.f32 %v271_v45, %v269_v5  ;;  %v292_v18 = vld [vmem:[%s1986_s12 + $0x8] sm:$0xff]  ;;  %v1444_v20 = vld [vmem:[%s1881_s14 + $0x210] ss:$8 sps:$4 sm:$0xff]   ;;  %s257_s28 = scalar_lea.vmem [#allocation8], %s1256_s20  ;;  %s1260_s29 = sshll.u32 %s1708_s19, 8 }
  0x91   : > { %891 = vmatpush1.bf16.msra.mxu0 %v1385_v26  ;;  %v283_v10 = vmul.f32 %v282_v47, %v280_v6  ;;  %v1443_v12 = vld [vmem:[%s1881_s14 + $0x204] ss:$8 sps:$4 sm:$0xff]   ;;  %v1441_v16 = vld [vmem:[%s1881_s14 + $0x200] ss:$8 sps:$4 sm:$0xff]   ;;  %v295_v19 = vmul.f32 %v293_v15, %v292_v18  ;;  %v1452_v24 = vld [vmem:[%s1881_s14 + $0x234] ss:$8 sps:$4 sm:$0xff]   ;;  %s2029_s9 = scalar_lea.hbm %s2076_s4, %s1260_s29 }
  0x92   : > { %932 = vmatpush1.bf16.msra.mxu1 %v1386_v27  ;;  %892 = vmatprep.subr.bf16.mxu0 %v1387_v28  ;;  %v296_v13 = vpack.c.bf16 %v272_v9, %v272_v9  ;;  %v1449_v22 = vld [vmem:[%s1881_s14 + $0x224] ss:$8 sps:$4 sm:$0xff]   ;;  %v1447_v23 = vld [vmem:[%s1881_s14 + $0x220] ss:$8 sps:$4 sm:$0xff]   ;;  %v1450_v25 = vld [vmem:[%s1881_s14 + $0x230] ss:$8 sps:$4 sm:$0xff]  }
  0x93   : > { %933 = vmatprep.subr.bf16.mxu1 %v1389_v29  ;;  %v298_v14 = vpack.c.bf16 %v283_v10, %v283_v10  ;;  %v301_v21 = vpack.c.bf16 %v295_v19, %v295_v19  ;;  %v1455_v26 = vld [vmem:[%s1881_s14 + $0x244] ss:$8 sps:$4 sm:$0xff]   ;;  %v1453_v27 = vld [vmem:[%s1881_s14 + $0x240] ss:$8 sps:$4 sm:$0xff]   ;;  %v1458_v28 = vld [vmem:[%s1881_s14 + $0x254] ss:$8 sps:$4 sm:$0xff]  }
  0x94   : > { %v1456_v29 = vld [vmem:[%s1881_s14 + $0x250] ss:$8 sps:$4 sm:$0xff]   ;;  %v1483_v47 = vld [vmem:[%s1881_s14 + $0x2e0] ss:$8 sps:$4 sm:$0xff]   ;;  %s1006_s19 = scalar_lea.sflag [#allocation4], %s1877_s23  ;;  %p2094_p9 = scmp.ne.s32.totalorder %s2085_s7, 0 }
  0x95   : > { %893 = vmatpush1.bf16.msra.mxu0 %v1391_v30  ;;  %v1461_v30 = vld [vmem:[%s1881_s14 + $0x264] ss:$8 sps:$4 sm:$0xff]   ;;  %v1480_v45 = vld [vmem:[%s1881_s14 + $0x2d0] ss:$8 sps:$4 sm:$0xff]   ;;  %s1661_s11 = smov [#allocation11]  }
  0x96   : > { %934 = vmatpush1.bf16.msra.mxu1 %v1392_v31  ;;  %894 = vmatprep.subr.bf16.mxu0 %v1393_v32  ;;  %v1459_v31 = vld [vmem:[%s1881_s14 + $0x260] ss:$8 sps:$4 sm:$0xff]   ;;  %v1464_v32 = vld [vmem:[%s1881_s14 + $0x274] ss:$8 sps:$4 sm:$0xff]   ;;  %v1486_v51 = vld [vmem:[%s1881_s14 + $0x2f0] ss:$8 sps:$4 sm:$0xff]  }
  0x97   : > { %935 = vmatprep.subr.bf16.mxu1 %v1395_v33  ;;  %v1462_v33 = vld [vmem:[%s1881_s14 + $0x270] ss:$8 sps:$4 sm:$0xff]   ;;  %s1577_s13 = sshll.u32 %s1661_s11, 4  ;;  %s1578_s13 = int_to_ptr.vmem [resolvable:$false] %s1577_s13 }
  0x98   : > { %s1579_s24 = scalar_lea.vmem %s1578_s13, 512 }
  0x99   : > { %895 = vmatpush1.bf16.msra.mxu0 %v1397_v34  ;;  %v1467_v34 = vld [vmem:[%s1881_s14 + $0x284] ss:$8 sps:$4 sm:$0xff]  }
  0x9a   : > { %936 = vmatpush1.bf16.msra.mxu1 %v1398_v35  ;;  %896 = vmatprep.subr.bf16.mxu0 %v1399_v36  ;;  %v1465_v35 = vld [vmem:[%s1881_s14 + $0x280] ss:$8 sps:$4 sm:$0xff]   ;;  %v1470_v36 = vld [vmem:[%s1881_s14 + $0x294] ss:$8 sps:$4 sm:$0xff]  }
  0x9b   : > { %937 = vmatprep.subr.bf16.mxu1 %v1401_v37  ;;  %v1468_v37 = vld [vmem:[%s1881_s14 + $0x290] ss:$8 sps:$4 sm:$0xff]  }
  0x9d   : > { %897 = vmatpush1.bf16.msra.mxu0 %v1403_v38  ;;  %v1473_v38 = vld [vmem:[%s1881_s14 + $0x2a4] ss:$8 sps:$4 sm:$0xff]  }
  0x9e   : > { %938 = vmatpush1.bf16.msra.mxu1 %v1404_v39  ;;  %898 = vmatprep.subr.bf16.mxu0 %v1405_v40  ;;  %v1471_v39 = vld [vmem:[%s1881_s14 + $0x2a0] ss:$8 sps:$4 sm:$0xff]   ;;  %v1476_v40 = vld [vmem:[%s1881_s14 + $0x2b4] ss:$8 sps:$4 sm:$0xff]  }
  0x9f   : > { %939 = vmatprep.subr.bf16.mxu1 %v1407_v41  ;;  %v1474_v41 = vld [vmem:[%s1881_s14 + $0x2b0] ss:$8 sps:$4 sm:$0xff]  }
  0xa1   : > { %899 = vmatpush1.bf16.msra.mxu0 %v1409_v42  ;;  %v1479_v42 = vld [vmem:[%s1881_s14 + $0x2c4] ss:$8 sps:$4 sm:$0xff]  }
  0xa2   : > { %940 = vmatpush1.bf16.msra.mxu1 %v1410_v43  ;;  %900 = vmatprep.subr.bf16.mxu0 %v1411_v44  ;;  %v1477_v43 = vld [vmem:[%s1881_s14 + $0x2c0] ss:$8 sps:$4 sm:$0xff]   ;;  %v1482_v44 = vld [vmem:[%s1881_s14 + $0x2d4] ss:$8 sps:$4 sm:$0xff]  }
  0xa3   : > { %941 = vmatprep.subr.bf16.mxu1 %v1413_v46  ;;  %v1485_v46 = vld [vmem:[%s1881_s14 + $0x2e4] ss:$8 sps:$4 sm:$0xff]  }
  0xa5   : > { %901 = vmatpush1.bf16.msra.mxu0 %v1415_v48  ;;  %v291_v48 = vld [vmem:[%s1986_s12] sm:$0xff] }
  0xa6   : > { %942 = vmatpush1.bf16.msra.mxu1 %v1416_v49  ;;  %902 = vmatprep.subr.bf16.mxu0 %v1417_v52  ;;  %v1488_v49 = vld [vmem:[%s1881_s14 + $0x2f4] ss:$8 sps:$4 sm:$0xff]   ;;  %v294_v50 = vmul.f32 %v293_v15, %v291_v48  ;;  %s1143_s14 = sshll.u32 %s1877_s23, 4 }
  0xa7   : > { %943 = vmatprep.subr.bf16.mxu1 %v1419_v55  ;;  %s253_s30 = scalar_lea.vmem [#allocation11], %s1143_s14 }
  0xa8   : > { %v300_v52 = vpack.c.bf16 %v294_v50, %v294_v50  ;;  %s1020_s5 = sshll.u32 %s253_s30, 4  ;;  %s2031_s5 = int_to_ptr.vmem [resolvable:$true] %s1020_s5 }
  0xa9   : > { %903 = vmatpush1.bf16.msra.mxu0 %v1421_v58  ;;  %s1573_s10 = scalar_lea.vmem %s2031_s5, 256  ;;  %p1580_p1 = scmp.lt.s32.totalorder %s2031_s5, %s1578_s13 }
  0xaa   : > { %944 = vmatpush1.bf16.msra.mxu1 %v1422_v59  ;;  %904 = vmatprep.subr.bf16.mxu0 %v1423_v60  ;;  %p1574_p7 = scmp.ne.s32.totalorder %s2031_s5, %s1573_s10  ;;  %p1581_p2 = scmp.lt.s32.totalorder %s1579_s24, %s1573_s10 }
  0xab   : > { %945 = vmatprep.subr.bf16.mxu1 %v1425_v61 }
  0xac   : > { %p1575_p13 = pnand %p1574_p7, %p2094_p9  ;;  %p1582_p6 = por %p1581_p2, %p1580_p1 }
  0xad   : > { %905 = vmatpush1.bf16.msra.mxu0 %v1427_v62 }
  0xae   : > { %946 = vmatpush1.bf16.msra.mxu1 %v1428_v63  ;;  %906 = vmatprep.subr.bf16.mxu0 %v1429_v0  ;;  %v258_v63 = vld [vmem:[%s257_s28] sm:$0xff]  ;;  %v260_v0 = vstv %s254_s21  ;;  %p1576_p3 = pneg %p1575_p13 }
  0xaf   : > { %947 = vmatprep.subr.bf16.mxu1 %v1431_v1  ;;  %v259_v1 = vld [vmem:[%s257_s28 + $0x8] sm:$0xff] }
  0xb0   : > { %p1583_p0 = pnand %p1582_p6, %p1576_p3 }
  0xb1   : > { %907 = vmatpush1.bf16.msra.mxu0 %v1433_v2  ;;  %v261_v2 = vmul.f32 %v260_v0, %v258_v63 }
  0xb2   : > { %948 = vmatpush1.bf16.msra.mxu1 %v1434_v3  ;;  %908 = vmatprep.subr.bf16.mxu0 %v1435_v4  ;;  %v262_v4 = vmul.f32 %v260_v0, %v259_v1 }
  0xb3   : > { %949 = vmatprep.subr.bf16.mxu1 %v1437_v7 }
  0xb5   : > { %909 = vmatpush1.bf16.msra.mxu0 %v1439_v8 }
  0xb6   : > { %950 = vmatpush1.bf16.msra.mxu1 %v1440_v11  ;;  %960 = vmatprep.subr.bf16.mxu0 %v1443_v12 }
  0xb8   : > { %911 = vmatmul.mubr.bf16.vlgmr.msra.gmra.mrb[0].mxu0 %v296_v13 }
  0xb9   : > { %952 = vmatmul.mubr.bf16.vlgmr.msra.gmra.mrb[0].mxu1 %v298_v14  ;;  %961 = vmatpush1.bf16.msra.mxu0 %v1441_v16 }
  0xba   : > { %962 = vmatprep.subr.bf16.mxu0 %v1446_v17  ;;  %992 = vmatprep.mubr.bf16.mxu0 %v301_v21 }
  0xbd   : > { %963 = vmatpush1.bf16.msra.mxu0 %v1444_v20 }
  0xbe   : > { %964 = vmatprep.subr.bf16.mxu0 %v1449_v22 }
  0xc1   : > { %965 = vmatpush1.bf16.msra.mxu0 %v1447_v23 }
  0xc2   : > { %966 = vmatprep.subr.bf16.mxu0 %v1452_v24 }
  0xc5   : > { %967 = vmatpush1.bf16.msra.mxu0 %v1450_v25 }
  0xc6   : > { %968 = vmatprep.subr.bf16.mxu0 %v1455_v26 }
  0xc9   : > { %969 = vmatpush1.bf16.msra.mxu0 %v1453_v27 }
  0xca   : > { %970 = vmatprep.subr.bf16.mxu0 %v1458_v28 }
  0xcd   : > { %971 = vmatpush1.bf16.msra.mxu0 %v1456_v29 }
  0xce   : > { %972 = vmatprep.subr.bf16.mxu0 %v1461_v30 }
  0xd1   : > { %973 = vmatpush1.bf16.msra.mxu0 %v1459_v31 }
  0xd2   : > { %974 = vmatprep.subr.bf16.mxu0 %v1464_v32 }
  0xd5   : > { %975 = vmatpush1.bf16.msra.mxu0 %v1462_v33 }
  0xd6   : > { %976 = vmatprep.subr.bf16.mxu0 %v1467_v34 }
  0xd9   : > { %977 = vmatpush1.bf16.msra.mxu0 %v1465_v35 }
  0xda   : > { %978 = vmatprep.subr.bf16.mxu0 %v1470_v36 }
  0xdd   : > { %979 = vmatpush1.bf16.msra.mxu0 %v1468_v37 }
  0xde   : > { %980 = vmatprep.subr.bf16.mxu0 %v1473_v38 }
  0xe1   : > { %981 = vmatpush1.bf16.msra.mxu0 %v1471_v39 }
  0xe2   : > { %982 = vmatprep.subr.bf16.mxu0 %v1476_v40 }
  0xe5   : > { %983 = vmatpush1.bf16.msra.mxu0 %v1474_v41 }
  0xe6   : > { %984 = vmatprep.subr.bf16.mxu0 %v1479_v42 }
  0xe9   : > { %985 = vmatpush1.bf16.msra.mxu0 %v1477_v43 }
  0xea   : > { %986 = vmatprep.subr.bf16.mxu0 %v1482_v44 }
  0xed   : > { %987 = vmatpush1.bf16.msra.mxu0 %v1480_v45 }
  0xee   : > { %988 = vmatprep.subr.bf16.mxu0 %v1485_v46 }
  0xf1   : > { %989 = vmatpush1.bf16.msra.mxu0 %v1483_v47 }
  0xf2   : > { %990 = vmatprep.subr.bf16.mxu0 %v1488_v49 }
  0xf5   : > { %991 = vmatpush1.bf16.msra.mxu0 %v1486_v51 }
  0xf8   : > { %993 = vmatmul.mubr.bf16.vlgmr.msra.gmra.mrb[4].mxu0 %v300_v52 }
 0x18b   : > { %v912_v53 = vpop.f32.mrb[0].mxu0 }
 0x18c   : > { %v953_v54 = vpop.f32.mrb[0].mxu1  ;;  %v914_v56 = vpop.f32.mrb[1].mxu0 }
 0x18d   : > { %v954_v55 = vadd.f32 %v953_v54, %v912_v53  ;;  %v955_v57 = vpop.f32.mrb[1].mxu1  ;;  %v916_v59 = vpop.f32.mrb[2].mxu0 }
 0x18e   : > { %v956_v58 = vadd.f32 %v955_v57, %v914_v56  ;;  %v957_v60 = vpop.f32.mrb[2].mxu1  ;;  %v917_v61 = vpop.f32.mrb[3].mxu0 }
 0x18f   : > { %v958_v62 = vpop.f32.mrb[3].mxu1 }
 0x1cb   : > { %v994_v3 = vpop.f32.mrb[4].mxu0 }
 0x1cc   : > { %v995_v5 = vadd.f32 %v994_v3, %v954_v55  ;;  %v996_v6 = vpop.f32.mrb[5].mxu0 }
 0x1cd   : > { %v997_v7 = vadd.f32 %v996_v6, %v956_v58  ;;  %v998_v8 = vpop.f32.mrb[6].mxu0 }
 0x1ce   : > { %v1001_v9 = vadd.f32 %v995_v5, %v261_v2  ;;  %v999_v10 = vpop.f32.mrb[7].mxu0 }
 0x1cf   : > { %v1002_v11 = vadd.f32 %v997_v7, %v262_v4 }
 0x1d0   : > { %1003 = vst [vmem:[%s253_s30] sm:$0xff] %v1001_v9 }
 0x1d1   : > { %1004 = vst [vmem:[%s253_s30 + $0x8] sm:$0xff] %v1002_v11 }
 0x1d2   : > { %1586 = shalt.err (!%p1583_p0)
}
 0x1d3   : > { %s1587_s23 = scalar_lea.hbm %s2029_s9, 256  ;;  %s1591_s21 = scalar_lea.hbm %s2076_s4, 1024 }
 0x1d4   : > { %p1588_p5 = scmp.ne.s32.totalorder %s2029_s9, %s1587_s23  ;;  %p1592_p12 = scmp.lt.u32.totalorder %s2029_s9, %s2076_s4 }
 0x1d5   : > { %p1593_p10 = scmp.lt.u32.totalorder %s1591_s21, %s1587_s23  ;;  %p1595_p7 = scmp.lt.u32.totalorder %s1587_s23, %s2029_s9 }
 0x1d6   : > { %p1589_p4 = pnand %p1588_p5, %p2094_p9 }
 0x1d7   : > { %p1594_p8 = por %p1593_p10, %p1592_p12 }
 0x1d8   : > { %p1590_p11 = pneg %p1589_p4 }
 0x1d9   : > { %p1596_p13 = por %p1595_p7, %p1594_p8 }
 0x1db   : > { %p1597_p3 = pnand %p1596_p13, %p1590_p11 }
 0x1dd   : > { %1600 = shalt.err (!%p1597_p3)
}
 0x1de   : > { %1278 = dma.vmem_to_hbm [thread:$0]  (%p2094_p9), %s2031_s5, 256, %s2029_s9, %s1006_s19  }
 0x1df PF: > { %p1305_p1 = scmp.ge.s32.totalorder %s1651_s18, 2  ;;  %s1032_s28 = sand.u32 1, %s1639_s15  }
 0x1e0   : > { %p2095_p2 = scmp.ne.s32.totalorder %s2081_s22, 0  ;;  %s1033_s29 = scalar_lea.sflag [#allocation4], %s1032_s28 }
 0x1e2   : > { %p1295_p6 = pnand %p1305_p1, %p2095_p2 }
 0x1e4   : > { %1634 = dma.done.wait (!%p1295_p6), %s1033_s29, 256  }
 0x1e5   : > { %1636 = vsyncadd (!%p1295_p6), %s1033_s29, 4294967040  ;;  %p20_p0 = scmp.ge.s32.totalorder %s1742_s27, 6   ;;  %s2096_s15 = smov %s1643_s16 }
 0x1e6   : > { %s2097_s16 = smov %s1647_s17  ;;  %s2098_s17 = smov %s1813_s6 }
 0x1e7   : > { %s2099_s18 = smov %s1742_s27  ;;  %22 = sbr.rel (!%p20_p0) target bundleno = 8 (0x8), region = 99 }
 0x1ee   :  { %1038 = vsyncpa [#allocation3], 1 }
 0x1ef   :  { %1040 = vsyncpa [#allocation3 + $0x1], 1 }
 0x1f0   :  { %1041 = vsyncpa [#allocation10], 1 }
 0x1f1   :  { %1043 = vsyncpa [#allocation10 + $0x1], 1 }
 0x1f2   :  { %1044 = vsyncpa [#allocation4], 1 }
 0x1f3   :  { %1046 = vsyncpa [#allocation4 + $0x1], 1 }
 0x1f4   :  { %1047 = vsyncpa [#allocation5], 1 }
 0x1f5   :  { %1049 = vsyncpa [#allocation5 + $0x1], 1 }
 0x1f6   :  { %1050 = vsyncpa [#allocation7], 1 }

</bundles_post_ra>
